<compile_context>
chip_gen: v6e
topology: v6e:2x2x1
jax: 0.10.0
libtpu: 0.0.40
codegen_flags: <defaults>
</compile_context>

<pallas_src>
import jax
import jax.numpy as jnp
from jax.experimental import pallas as pl
from jax.experimental.pallas import tpu as pltpu

BN_EPS = 1e-5
K = 3            # Conv1d kernel size (from the module spec)
PAD = 1          # 'same' padding for K=3, stride=1

# MXU operand dtype.  bf16 is native MXU rate on all current TPUs; accumulation stays
# f32 (preferred_element_type) and every elementwise op is f32, so error is ~1e-3 rel.
MXU_DTYPE = jnp.bfloat16


# ----------------------------------------------------------------------------
# Fused resblock kernel: conv1+BN1+ReLU -> conv2+BN2+ReLU -> residual add
# ----------------------------------------------------------------------------
def _resblock_kernel(x_ref, w1_ref, b1_ref, w2_ref, b2_ref, out_ref):
    # x_ref  : (NB, C, L) f32 input tile (NB batch elements per grid step)
    # w*_ref : (C, K*C)   bf16 im2col weights with BN scale folded in:
    #                     w_im[c_out, k*C + c_in] = w[c_out, c_in, k] * bn_scale[c_out]
    # b*_ref : (C, 1)     f32 folded BN shift (conv bias included)
    # out_ref: (NB, C, L) f32 output tile
    NB, C, L = x_ref.shape
    lane = jax.lax.broadcasted_iota(jnp.int32, (C, L), 1)   # hoisted, reused by both convs
    w1 = w1_ref[...]
    w2 = w2_ref[...]
    b1 = b1_ref[...]
    b2 = b2_ref[...]

    def conv_bn_relu(src, w_im, shift):
        # Build the K shifted tap views with lane rotations (XLU) + lane masks (VPU
        # select): view_k[:, l] = src[:, l + k - PAD], zero outside [0, L).
        views = []
        for k in range(K):                         # static unroll (K = 3)
            sh = k - PAD
            if sh == 0:
                v = src
            else:
                rolled = pltpu.roll(src, shift=(-sh) % L, axis=1)
                if sh < 0:
                    v = jnp.where(lane >= -sh, rolled, 0.0)      # zero left halo
                else:
                    v = jnp.where(lane < L - sh, rolled, 0.0)    # zero right halo
            views.append(v)
        # f32 concat at 8-sublane-aligned boundaries, then one cast to the MXU dtype.
        im = jnp.concatenate(views, axis=0).astype(MXU_DTYPE)    # (K*C, L), value only
        # One MXU dot per conv, f32 accumulation.  (MXU is <5% utilised at C=8 by
        # construction of the layer — data movement, not matmul, is the cost here.)
        y = jnp.dot(w_im, im, preferred_element_type=jnp.float32)   # (C, L) f32
        return jnp.maximum(y + shift, 0.0)         # folded BN shift + ReLU, f32

    for n in range(NB):                            # static unroll over batch in block
        x = x_ref[n]                               # (C, L) f32 — kept for the residual
        h1 = conv_bn_relu(x, w1, b1)
        h2 = conv_bn_relu(h1, w2, b2)
        out_ref[n] = h2 + x                        # residual add, single aligned store


def _pick_batch_block(n, max_block=8):
    # Fatter grid steps amortise the ~0.35 us per-step cost, but keep >= 2 steps so
    # both TensorCores on v7x have work.
    if n <= 2:
        return 1
    for nb in range(min(max_block, n // 2), 0, -1):
        if n % nb == 0:
            return nb
    return 1


def resblock_forward(params, x):
    # x: (N, C, L) or (C, L) — mirrors torch Conv1d input conventions
    if x.ndim == 2:
        x = x[None]
    x = x.astype(jnp.float32)
    N, C, L = x.shape

    def fold(p):
        # Eval-mode BatchNorm1d folded into the conv: BN scale goes into the weights,
        # BN shift (with the conv bias) stays as a per-channel add.
        scale = p["gamma"] / jnp.sqrt(p["var"] + BN_EPS)                  # (C,)
        shift = p["beta"] + (p["b"] - p["mean"]) * scale                  # (C,)
        w_im = jnp.transpose(p["w"], (0, 2, 1)).reshape(C, K * C)         # (C_out, K*C_in)
        w_im = w_im * scale[:, None]                                      # fold BN scale
        return w_im.astype(MXU_DTYPE), shift.reshape(C, 1).astype(jnp.float32)

    w1, b1 = fold(params["conv1"])
    w2, b2 = fold(params["conv2"])

    nb = _pick_batch_block(N)
    grid = (N // nb,)

    # Actual VMEM need is ~4 tiles of (nb, C, L) f32 (double-buffered in/out) plus tiny
    # params; request that with headroom — far under v7x's 64 MiB physical VMEM.
    tile_bytes = nb * C * L * 4
    vmem_limit = int(min(64 * 1024 * 1024, max(8 * 1024 * 1024, 16 * tile_bytes)))

    return pl.pallas_call(
        _resblock_kernel,
        out_shape=jax.ShapeDtypeStruct((N, C, L), jnp.float32),
        grid=grid,
        in_specs=[
            pl.BlockSpec((nb, C, L), lambda i: (i, 0, 0)),   # x: nb batch elems / step
            pl.BlockSpec((C, K * C), lambda i: (0, 0)),      # w1 (im2col, BN-scaled)
            pl.BlockSpec((C, 1), lambda i: (0, 0)),          # shift1
            pl.BlockSpec((C, K * C), lambda i: (0, 0)),      # w2
            pl.BlockSpec((C, 1), lambda i: (0, 0)),          # shift2
        ],
        out_specs=pl.BlockSpec((nb, C, L), lambda i: (i, 0, 0)),
        compiler_params=pltpu.CompilerParams(
            dimension_semantics=("parallel",),               # batch -> both TCs on v7x
            vmem_limit_bytes=vmem_limit),
    )(x, w1, b1, w2, b2)


# ----------------------------------------------------------------------------
# deterministic synthetic parameters + pure-JAX reference (correctness gate)
# ----------------------------------------------------------------------------
def init_params(key, C):
    def conv_bn(k):
        k1, k2, k3, k4 = jax.random.split(k, 4)
        return dict(
            w=jax.random.normal(k1, (C, C, K), jnp.float32) / jnp.sqrt(C * K),
            b=0.01 * jax.random.normal(k2, (C,), jnp.float32),
            gamma=1.0 + 0.05 * jax.random.normal(k3, (C,), jnp.float32),
            beta=0.05 * jax.random.normal(k4, (C,), jnp.float32),
            mean=jnp.zeros((C,), jnp.float32),    # running stats (eval-mode BN)
            var=jnp.ones((C,), jnp.float32),
        )
    k1, k2 = jax.random.split(key)
    return {"conv1": conv_bn(k1), "conv2": conv_bn(k2)}


def resblock_ref(params, x):
    # Pure-JAX reference of the PyTorch module (eval-mode BN).
    def conv_bn_relu(p, h):
        y = jax.lax.conv_general_dilated(
            h, p["w"], window_strides=(1,), padding=((PAD, PAD),),
            dimension_numbers=("NCH", "OIH", "NCH"))
        y = y + p["b"][None, :, None]
        scale = p["gamma"] / jnp.sqrt(p["var"] + BN_EPS)
        y = (y - p["mean"][None, :, None]) * scale[None, :, None] + p["beta"][None, :, None]
        return jnp.maximum(y, 0.0)
    h = conv_bn_relu(params["conv1"], x)
    h = conv_bn_relu(params["conv2"], h)
    return h + x


if __name__ == "__main__":
    N, C, L = 2, 8, 1024            # small shapes: batch=2, ni=8 channels, seq=1024
    key = jax.random.PRNGKey(0)
    kp, kx = jax.random.split(key)
    params = init_params(kp, C)
    x = jax.random.normal(kx, (N, C, L), jnp.float32)

    fwd = jax.jit(resblock_forward)
    out = fwd(params, x)
    jax.block_until_ready(out)
    assert out.shape == (N, C, L) and out.dtype == jnp.float32

    ref = resblock_ref(params, x)
    err = float(jnp.max(jnp.abs(out - ref)))
    assert err < 1e-1, f"kernel/reference mismatch: max abs err {err}"   # bf16 MXU tolerance
    print("KERNEL_OK")
</pallas_src>

<mosaic_0001>
module attributes {stable_mosaic.version = 11 : i64} {
  func.func @_resblock_kernel(%arg0: i32, %arg1: memref<1x8x1024xf32, #tpu.memory_space<vmem>>, %arg2: memref<8x24xbf16, #tpu.memory_space<vmem>>, %arg3: memref<8x1xf32, #tpu.memory_space<vmem>>, %arg4: memref<8x24xbf16, #tpu.memory_space<vmem>>, %arg5: memref<8x1xf32, #tpu.memory_space<vmem>>, %arg6: memref<1x8x1024xf32, #tpu.memory_space<vmem>>) attributes {dimension_semantics = [#tpu.dimension_semantics<parallel>], iteration_bounds = array<i64: 2>, scalar_prefetch = 0 : i64, scratch_operands = 0 : i64, tpu.core_type = #tpu.core_type<tc>, window_params = [{transform_indices = @transform_0, window_bounds = array<i64: 1, 8, 1024>}, {pipeline_mode = #tpu.pipeline_mode<synchronous>, transform_indices = @transform_1, window_bounds = array<i64: 8, 24>}, {pipeline_mode = #tpu.pipeline_mode<synchronous>, transform_indices = @transform_2, window_bounds = array<i64: 8, 1>}, {pipeline_mode = #tpu.pipeline_mode<synchronous>, transform_indices = @transform_3, window_bounds = array<i64: 8, 24>}, {pipeline_mode = #tpu.pipeline_mode<synchronous>, transform_indices = @transform_4, window_bounds = array<i64: 8, 1>}, {transform_indices = @transform_5, window_bounds = array<i64: 1, 8, 1024>}]} {
    %0 = tpu.iota {dimensions = array<i32: 1>} : vector<8x1024xi32>
    %c0 = arith.constant 0 : index
    %c0_0 = arith.constant 0 : index
    %1 = vector.load %arg2[%c0, %c0_0] : memref<8x24xbf16, #tpu.memory_space<vmem>>, vector<8x24xbf16>
    %c0_1 = arith.constant 0 : index
    %c0_2 = arith.constant 0 : index
    %2 = vector.load %arg4[%c0_1, %c0_2] : memref<8x24xbf16, #tpu.memory_space<vmem>>, vector<8x24xbf16>
    %c0_3 = arith.constant 0 : index
    %c0_4 = arith.constant 0 : index
    %3 = vector.load %arg3[%c0_3, %c0_4] : memref<8x1xf32, #tpu.memory_space<vmem>>, vector<8x1xf32>
    %c0_5 = arith.constant 0 : index
    %c0_6 = arith.constant 0 : index
    %4 = vector.load %arg5[%c0_5, %c0_6] : memref<8x1xf32, #tpu.memory_space<vmem>>, vector<8x1xf32>
    %c0_7 = arith.constant 0 : index
    %c0_8 = arith.constant 0 : index
    %c0_9 = arith.constant 0 : index
    %5 = vector.load %arg1[%c0_7, %c0_8, %c0_9] : memref<1x8x1024xf32, #tpu.memory_space<vmem>>, vector<1x8x1024xf32>
    %6 = vector.shape_cast %5 : vector<1x8x1024xf32> to vector<8x1024xf32>
    %c1_i32 = arith.constant 1 : i32
    %7 = tpu.dynamic_rotate %6 by %c1_i32 dim 1 : vector<8x1024xf32>, i32 -> vector<8x1024xf32>
    %c1_i32_10 = arith.constant 1 : i32
    %8 = vector.broadcast %c1_i32_10 : i32 to vector<8x1024xi32>
    %9 = arith.cmpi sge, %0, %8 : vector<8x1024xi32>
    %cst = arith.constant 0.000000e+00 : f32
    %10 = vector.broadcast %cst : f32 to vector<8x1024xf32>
    %11 = arith.select %9, %7, %10 : vector<8x1024xi1>, vector<8x1024xf32>
    %c1023_i32 = arith.constant 1023 : i32
    %12 = tpu.dynamic_rotate %6 by %c1023_i32 dim 1 : vector<8x1024xf32>, i32 -> vector<8x1024xf32>
    %c1023_i32_11 = arith.constant 1023 : i32
    %13 = vector.broadcast %c1023_i32_11 : i32 to vector<8x1024xi32>
    %14 = arith.cmpi slt, %0, %13 : vector<8x1024xi32>
    %cst_12 = arith.constant 0.000000e+00 : f32
    %15 = vector.broadcast %cst_12 : f32 to vector<8x1024xf32>
    %16 = arith.select %14, %12, %15 : vector<8x1024xi1>, vector<8x1024xf32>
    %17 = tpu.concatenate %11, %6, %16 in 0 : vector<8x1024xf32>, vector<8x1024xf32>, vector<8x1024xf32> -> vector<24x1024xf32>
    %18 = arith.truncf %17 : vector<24x1024xf32> to vector<24x1024xbf16>
    %cst_13 = arith.constant dense<0.000000e+00> : vector<8x1024xf32>
    %19 = tpu.matmul %1, %18, %cst_13 {dimension_numbers = #tpu.dot_dimension_numbers<[1], [0], [0], [1], [0, 0, 1, 1], [], []>} : vector<8x24xbf16>, vector<24x1024xbf16>, vector<8x1024xf32> -> vector<8x1024xf32>
    %20 = vector.broadcast %3 : vector<8x1xf32> to vector<8x1024xf32>
    %21 = arith.addf %19, %20 : vector<8x1024xf32>
    %cst_14 = arith.constant 0.000000e+00 : f32
    %22 = vector.broadcast %cst_14 : f32 to vector<8x1024xf32>
    %23 = arith.maximumf %21, %22 : vector<8x1024xf32>
    %c1_i32_15 = arith.constant 1 : i32
    %24 = tpu.dynamic_rotate %23 by %c1_i32_15 dim 1 : vector<8x1024xf32>, i32 -> vector<8x1024xf32>
    %c1_i32_16 = arith.constant 1 : i32
    %25 = vector.broadcast %c1_i32_16 : i32 to vector<8x1024xi32>
    %26 = arith.cmpi sge, %0, %25 : vector<8x1024xi32>
    %cst_17 = arith.constant 0.000000e+00 : f32
    %27 = vector.broadcast %cst_17 : f32 to vector<8x1024xf32>
    %28 = arith.select %26, %24, %27 : vector<8x1024xi1>, vector<8x1024xf32>
    %c1023_i32_18 = arith.constant 1023 : i32
    %29 = tpu.dynamic_rotate %23 by %c1023_i32_18 dim 1 : vector<8x1024xf32>, i32 -> vector<8x1024xf32>
    %c1023_i32_19 = arith.constant 1023 : i32
    %30 = vector.broadcast %c1023_i32_19 : i32 to vector<8x1024xi32>
    %31 = arith.cmpi slt, %0, %30 : vector<8x1024xi32>
    %cst_20 = arith.constant 0.000000e+00 : f32
    %32 = vector.broadcast %cst_20 : f32 to vector<8x1024xf32>
    %33 = arith.select %31, %29, %32 : vector<8x1024xi1>, vector<8x1024xf32>
    %34 = tpu.concatenate %28, %23, %33 in 0 : vector<8x1024xf32>, vector<8x1024xf32>, vector<8x1024xf32> -> vector<24x1024xf32>
    %35 = arith.truncf %34 : vector<24x1024xf32> to vector<24x1024xbf16>
    %cst_21 = arith.constant dense<0.000000e+00> : vector<8x1024xf32>
    %36 = tpu.matmul %2, %35, %cst_21 {dimension_numbers = #tpu.dot_dimension_numbers<[1], [0], [0], [1], [0, 0, 1, 1], [], []>} : vector<8x24xbf16>, vector<24x1024xbf16>, vector<8x1024xf32> -> vector<8x1024xf32>
    %37 = vector.broadcast %4 : vector<8x1xf32> to vector<8x1024xf32>
    %38 = arith.addf %36, %37 : vector<8x1024xf32>
    %cst_22 = arith.constant 0.000000e+00 : f32
    %39 = vector.broadcast %cst_22 : f32 to vector<8x1024xf32>
    %40 = arith.maximumf %38, %39 : vector<8x1024xf32>
    %41 = arith.addf %40, %6 : vector<8x1024xf32>
    %c0_23 = arith.constant 0 : index
    %c0_24 = arith.constant 0 : index
    %c0_25 = arith.constant 0 : index
    %42 = vector.load %arg6[%c0_23, %c0_24, %c0_25] : memref<1x8x1024xf32, #tpu.memory_space<vmem>>, vector<1x8x1024xf32>
    %43 = vector.shape_cast %42 : vector<1x8x1024xf32> to vector<8x1024xf32>
    %44 = vector.shape_cast %41 : vector<8x1024xf32> to vector<1x8x1024xf32>
    tpu.vector_store %arg6[%c0_23, %c0_24, %c0_25], %44 {strides = array<i32>} : memref<1x8x1024xf32, #tpu.memory_space<vmem>>, vector<1x8x1024xf32>,
    return
  }
  func.func @transform_0(%arg0: i32) -> (i32, i32, i32) {
    %c0_i32 = arith.constant 0 : i32
    %c0_i32_0 = arith.constant 0 : i32
    %c0_i32_1 = arith.constant 0 : i32
    return %arg0, %c0_i32, %c0_i32_0 : i32, i32, i32
  }
  func.func @transform_1(%arg0: i32) -> (i32, i32) {
    %c0_i32 = arith.constant 0 : i32
    %c0_i32_0 = arith.constant 0 : i32
    %c0_i32_1 = arith.constant 0 : i32
    return %c0_i32, %c0_i32_0 : i32, i32
  }
  func.func @transform_2(%arg0: i32) -> (i32, i32) {
    %c0_i32 = arith.constant 0 : i32
    %c0_i32_0 = arith.constant 0 : i32
    %c0_i32_1 = arith.constant 0 : i32
    return %c0_i32, %c0_i32_0 : i32, i32
  }
  func.func @transform_3(%arg0: i32) -> (i32, i32) {
    %c0_i32 = arith.constant 0 : i32
    %c0_i32_0 = arith.constant 0 : i32
    %c0_i32_1 = arith.constant 0 : i32
    return %c0_i32, %c0_i32_0 : i32, i32
  }
  func.func @transform_4(%arg0: i32) -> (i32, i32) {
    %c0_i32 = arith.constant 0 : i32
    %c0_i32_0 = arith.constant 0 : i32
    %c0_i32_1 = arith.constant 0 : i32
    return %c0_i32, %c0_i32_0 : i32, i32
  }
  func.func @transform_5(%arg0: i32) -> (i32, i32, i32) {
    %c0_i32 = arith.constant 0 : i32
    %c0_i32_0 = arith.constant 0 : i32
    %c0_i32_1 = arith.constant 0 : i32
    return %arg0, %c0_i32, %c0_i32_0 : i32, i32, i32
  }
}

</mosaic_0001>

<bundles_post_ra>
// kernel: resblock_forward.1
= control target key start
LH: loop header
LB: loop body
LE: loop exit
PB: predicated region body
PF: predicated region fallthrough
CT: control target
= control target key end

     0   :  { %10 = vsyncpa [#allocation3], 0  ;;  %s1508_s0 = inlined_call_operand.vmem [shape: f32[2,8,1024], index: 0, kind: input, shape index: {}]   ;;  %s1509_s1 = inlined_call_operand.vmem [shape: bf16[8,24], index: 1, kind: input, shape index: {}]   ;;  %s1510_s2 = inlined_call_operand.vmem [shape: f32[8,1], index: 2, kind: input, shape index: {}]   ;;  %s1511_s3 = inlined_call_operand.vmem [shape: bf16[8,24], index: 3, kind: input, shape index: {}]   ;;  %s1512_s4 = inlined_call_operand.vmem [shape: f32[8,1], index: 4, kind: input, shape index: {}]   ;;  %s1513_s5 = inlined_call_operand.hbm [shape: f32[2,8,1024], index: 5, kind: output, shape index: {}]  }
   0x1   :  { %12 = vsyncpa [#allocation3 + $0x1], 0  ;;  %s1166_s18 = smov 0   ;;  %s1168_s19 = smov 0  }
   0x2   :  { %s1170_s20 = smov 0   ;;  %s1172_s21 = smov 0  }
   0x3 LB: > { %s1187_s22 = sadd.s32 4294967295, %s1129_s21   ;;  %s923_s23 = sadd.s32 4294967294, %s1129_s21   ;;  %s1129_s21 = sphi %s1172_s21, %s1521_s21   ;;  %s1125_s20 = sphi %s1170_s20, %s1520_s20   ;;  %s1121_s19 = sphi %s1168_s19, %s1519_s19   ;;  %s1117_s18 = sphi %s1166_s18, %s1518_s18  }
   0x4   : > { %s1191_s24 = sadd.s32 1, %s1129_s21   ;;  %s135_s25 = sadd.s32 1, %s1125_s20 }
   0x5   : > { %s132_s26 = ssub.s32 %s1129_s21, %s1191_s24  ;;  %p145_p0 = scmp.ne.s32.totalorder %s1125_s20, %s1121_s19 }
   0x6   : > { %p133_p1 = scmp.eq.s32.totalorder %s132_s26, 0  ;;  %p146_p2 = scmp.eq.s32.totalorder %s1187_s22, 1 }
   0x7   : > { %p151_p3 = scmp.ne.s32.totalorder %s1121_s19, %s1117_s18  ;;  %p152_p4 = scmp.eq.s32.totalorder %s923_s23, 1 }
   0x8   : > { %s1202_s27 = scalar_select %p133_p1, %s1125_s20, %s135_s25  }
   0x9   : > { %p1204_p5 = por %p146_p2, %p145_p0  ;;  %p1208_p6 = por %p152_p4, %p151_p3 }
   0xa   : > { %p926_p7 = scmp.ge.s32.totalorder %s1129_s21, 1  ;;  %p190_p8 = scmp.lt.s32.totalorder %s1129_s21, 3 }
   0xc   : > { %p191_p9 = pnand %p926_p7, %p190_p8 }
   0xd   : > { %p218_p10 = scmp.lt.s32.totalorder (!%p191_p9), %s1187_s22, 1  ;;  %s1131_s10 = smov (!%p191_p9), 127  }
   0xe   : > { %194 = sbr.rel (%p191_p9) target bundleno = 717 (0x2cd), region = 40  ;;  %s1132_s11 = smov (!%p191_p9), 1  }
   0xf   : > { %s215_s26 = sand.u32 (!%p191_p9), 1, %s1121_s19   ;;  %s958_s7 = sshll.u32 (!%p191_p9), %s1187_s22, 10 }
  0x10   : > { %s1135_s13 = smov (!%p191_p9), [#allocation2]  }
  0x11   : > { %s1073_s14 = sshll.u32 (!%p191_p9), %s1135_s13, 4  ;;  %s1074_s14 = int_to_ptr.vmem [resolvable:$false] %s1073_s14 }
  0x12   : > { %s1075_s15 = scalar_lea.vmem (!%p191_p9), %s1074_s14, 2048 }
  0x13   : > { %s219_s30 = scalar_select %p218_p10, %s1187_s22, 1  ;;  %v1133_v11 = vmov 0   ;;  %v235_v14 = vld [vmem:[%s1510_s2] sm:$0xff]  ;;  %v224_v15 = vlaneseq  ;;  %vm352_vm2 = vcmask 1043456   ;;  %vm1134_vm4 = vmmov 1  }
  0x14   : > { %409 = vmatprep.mubr.bf16.mxu0 %v1133_v11  ;;  %450 = vmatprep.mubr.bf16.mxu1 %v1133_v11  ;;  %v233_v63 = vld [vmem:[%s1509_s1] sm:$0xf]  ;;  %vm348_vm7 = vcmask 195584   ;;  %s850_s22 = scalar_lea.sflag [#allocation3], %s215_s26 }
  0x15   : > { %s957_s6 = sshll.u32 %s219_s30, 6  ;;  %1037 = vset.pattern.permute.xlu1 %v1133_v11  ;;  %1068 = vset.pattern.permute.xlu0 %v1133_v11  ;;  %v1263_v16 = vand.u32 127, %v224_v15  ;;  %s927_s30 = sshll.u32 %s215_s26, 6 }
  0x16   : > { %s222_s9 = scalar_lea.vmem %s1508_s0, %s957_s6  ;;  %s1456_s6 = scalar_lea.vmem [#allocation2], %s927_s30 }
  0x17   : > { %v1219_v0 = vld [vmem:[%s222_s9 + $0x20] sm:$0xff]  ;;  %v1221_v1 = vld [vmem:[%s222_s9 + $0x28] sm:$0xff]  ;;  %v1229_v5 = vld [vmem:[%s222_s9 + $0x10] sm:$0xff]  ;;  %vm302_vm0 = vcmp.lt.s32.totalorder %v1263_v16, 127  ;;  %vm261_vm1 = vcmp.lt.s32.totalorder %v1263_v16, 1  ;;  %v1278_v36 = vadd.s32 896, %v1263_v16 }
  0x18   : > { %v1223_v2 = vld [vmem:[%s222_s9] sm:$0xff]  ;;  %v1012_v3 = vpack.i.bf16 %v1221_v1, %v1219_v0  ;;  %v1227_v4 = vld [vmem:[%s222_s9 + $0x8] sm:$0xff]  ;;  %v1231_v6 = vld [vmem:[%s222_s9 + $0x18] sm:$0xff]  ;;  %vm270_vm3 = vcmp.ge.s32.totalorder %v1263_v16, 1  ;;  %s864_s8 = sshll.u32 %s1456_s6, 4  ;;  %s865_s8 = int_to_ptr.vmem [resolvable:$true] %s864_s8 }
  0x19   : > { %v1002_v7 = vpack.i.bf16 %v1227_v4, %v1223_v2  ;;  %v1007_v8 = vpack.i.bf16 %v1231_v6, %v1229_v5  ;;  %v1239_v9 = vld [vmem:[%s222_s9 + $0x38] sm:$0xff]  ;;  %v1246_v12 = vld [vmem:[%s222_s9 + $0x30] sm:$0xff]  ;;  %vm1298_vm5 = vmpackc.low %vm1134_vm4, %vm270_vm3  ;;  %vm318_vm6 = vcmp.lt.s32.totalorder %v1278_v36, 1023  ;;  %s1069_s12 = scalar_lea.vmem %s865_s8, 1024  ;;  %p1076_p0 = scmp.lt.s32.totalorder %s865_s8, %s1074_s14 }
  0x1a   : > { %1013 = vrot.lane.b32.xlu1 %v1012_v3, %s1131_s10  ;;  %v1022_v10 = vpack.i.bf16 %v1229_v5, %v1239_v9  ;;  %v1027_v13 = vpack.i.bf16 %v1239_v9, %v1246_v12  ;;  %p1070_p11 = scmp.ne.s32.totalorder %s865_s8, %s1069_s12  ;;  %p1077_p1 = scmp.lt.s32.totalorder %s1075_s15, %s1069_s12 }
  0x1b   : > { %1003 = vrot.lane.b32.xlu0 %v1002_v7, %s1131_s10 }
  0x1c   : > { %p1071_p12 = pnand %p1070_p11, %p1204_p5  ;;  %p1078_p2 = por %p1077_p1, %p1076_p0 }
  0x1e   : > { %1018 = vrot.lane.b32.xlu1 %v1002_v7, %s1132_s11  ;;  %p1072_p13 = pneg %p1071_p12 }
  0x1f   : > { %1008 = vrot.lane.b32.xlu0 %v1007_v8, %s1131_s10 }
  0x20   : > { %p1079_p3 = pnand %p1078_p2, %p1072_p13 }
  0x22   : > { %251 = vrot.lane.b32.xlu1 %v1231_v6, %s1132_s11 }
  0x23   : > { %1023 = vrot.lane.b32.xlu0 %v1022_v10, %s1132_s11 }
  0x26   : > { %1033 = vrot.lane.b32.xlu1 %v1012_v3, %s1132_s11 }
  0x27   : > { %1028 = vrot.lane.b32.xlu0 %v1027_v13, %s1131_s10 }
  0x2a   : > { %345 = vperm.xlu1 %1037, %v235_v14  }
  0x2b   : > { %257 = vrot.lane.b32.xlu0 %v1246_v12, %s1132_s11 }
  0x8c   : > { %v1014_v17 = vpop.permute.xlu1 %1013 }
  0x8d   : > { %v1004_v18 = vpop.permute.xlu0 %1003  ;;  %v1015_v21 = vunpack.i.l.bf16 %v1014_v17  ;;  %v1016_v29 = vunpack.i.h.bf16 %v1014_v17 }
  0x8e   : > { %v1006_v19 = vunpack.i.h.bf16 %v1004_v18  ;;  %v1005_v20 = vunpack.i.l.bf16 %v1004_v18 }
  0x8f   : > { %v305_v46 = vsel %vm302_vm0, %v1015_v21, %v1016_v29 }
  0x90   : > { %v1019_v22 = vpop.permute.xlu1 %1018  ;;  %v309_v23 = vsel %vm302_vm0, %v1005_v20, %v1006_v19  ;;  %v339_v3 = vpack.c.bf16 %v305_v46, %v305_v46 }
  0x91   : > { %v1021_v24 = vunpack.i.h.bf16 %v1019_v22  ;;  %v1020_v25 = vunpack.i.l.bf16 %v1019_v22  ;;  %v1009_v26 = vpop.permute.xlu0 %1008  ;;  %v335_v30 = vpack.c.bf16 %v309_v23, %v309_v23 }
  0x92   : > { %v1011_v27 = vunpack.i.h.bf16 %v1009_v26  ;;  %v1010_v28 = vunpack.i.l.bf16 %v1009_v26  ;;  %v366_v22 = vsel %vm352_vm2, %v339_v3, 0 }
  0x93   : > { %v268_v31 = vsel %vm261_vm1, %v1020_v25, %v1021_v24  ;;  %v354_v44 = vsel %vm352_vm2, %v335_v30, 0 }
  0x94   : > { %v252_v32 = vpop.permute.xlu1 %251  ;;  %v308_v33 = vsel %vm302_vm0, %v1006_v19, %v1010_v28  ;;  %v306_v34 = vsel %vm302_vm0, %v1011_v27, %v1015_v21  ;;  %v307_v35 = vsel %vm302_vm0, %v1010_v28, %v1011_v27  ;;  %v328_v41 = vpack.c.bf16 %v1227_v4, %v268_v31 }
  0x95   : > { %v1024_v37 = vpop.permute.xlu0 %1023  ;;  %v336_v38 = vpack.c.bf16 %v308_v33, %v308_v33  ;;  %v338_v39 = vpack.c.bf16 %v306_v34, %v306_v34  ;;  %v337_v40 = vpack.c.bf16 %v307_v35, %v307_v35 }
  0x96   : > { %v1026_v42 = vunpack.i.h.bf16 %v1024_v37  ;;  %v1025_v43 = vunpack.i.l.bf16 %v1024_v37 }
  0x97   : > { %930 = vmatprep.subr.msk.bf16.mxu0 %vm352_vm2, %v336_v38  ;;  %935 = vmatprep.subr.msk.bf16.mxu1 %vm352_vm2, %v338_v39  ;;  %v360_v45 = vsel %vm352_vm2, %v337_v40, 0 }
  0x98   : > { %v269_v47 = vsel %vm261_vm1, %v1025_v43, %v1020_v25  ;;  %390 = vmatpush1.bf16.msra.mxu0 %v354_v44  ;;  %431 = vmatpush1.bf16.msra.mxu1 %v360_v45  ;;  %v1034_v48 = vpop.permute.xlu1 %1033  ;;  %v266_v49 = vsel %vm261_vm1, %v1026_v42, %v252_v32  ;;  %v267_v50 = vsel %vm261_vm1, %v1021_v24, %v1026_v42 }
  0x99   : > { %v932_v51 = vpack.c.bf16 %v1223_v2, %v269_v47  ;;  %v1036_v52 = vunpack.i.h.bf16 %v1034_v48  ;;  %v1035_v53 = vunpack.i.l.bf16 %v1034_v48  ;;  %v1029_v54 = vpop.permute.xlu0 %1028  ;;  %391 = vmatprep.subr.bf16.mxu0 %v328_v41  ;;  %v330_v55 = vpack.c.bf16 %v1231_v6, %v266_v49 }
  0x9a   : > { %v1031_v57 = vunpack.i.h.bf16 %v1029_v54  ;;  %v1030_v58 = vunpack.i.l.bf16 %v1029_v54  ;;  %v329_v59 = vpack.c.bf16 %v1229_v5, %v267_v50 }
  0x9b   : > { %432 = vmatprep.subr.bf16.mxu1 %v330_v55  ;;  %v264_v60 = vsel %vm261_vm1, %v1035_v53, %v1036_v52 }
  0x9c   : > { %v304_v61 = vsel %vm302_vm0, %v1016_v29, %v1030_v58  ;;  %v310_v62 = vsel %vm302_vm0, %v1031_v57, %v1005_v20  ;;  %933 = vmatpush1.bf16.msk.msra.mxu0 %vm1298_vm5, %v932_v51  ;;  %433 = vmatpush1.bf16.msra.mxu1 %v329_v59  ;;  %v303_v13 = vsel %vm302_vm0, %v1030_v58, %v1031_v57 }
  0x9d   : > { %v326_v7 = vsel %vm318_vm6, %v310_v62, 0.0  ;;  %v340_v8 = vpack.c.bf16 %v304_v61, %v304_v61  ;;  %v258_v10 = vpop.permute.xlu0 %257  ;;  %v341_v17 = vpack.c.bf16 %v303_v13, %v303_v13  ;;  %v332_v18 = vpack.c.bf16 %v1221_v1, %v264_v60 }
  0x9e   : > { %v262_v14 = vsel %vm261_vm1, %v258_v10, %v1025_v43  ;;  %v342_v15 = vpack.c.bf16 %v326_v7, %v326_v7  ;;  %v265_v20 = vsel %vm261_vm1, %v252_v32, %v1035_v53  ;;  %v263_v21 = vsel %vm261_vm1, %v1036_v52, %v258_v10  ;;  %v236_v7 = vld [vmem:[%s1512_s4] sm:$0xff] }
  0x9f   : > { %v334_v19 = vpack.c.bf16 %v1239_v9, %v262_v14  ;;  %934 = vmatmul.mubr.msk.bf16.vlgmr.msra.gmra.mxu0 %vm348_vm7, %v233_v63  ;;  %936 = vmatmul.mubr.msk.bf16.vlgmr.msra.gmra.mxu1 %vm348_vm7, %v233_v63  ;;  %v372_v23 = vsel %vm352_vm2, %v341_v17, 0  ;;  %v331_v24 = vpack.c.bf16 %v1219_v0, %v265_v20  ;;  %v333_v25 = vpack.c.bf16 %v1246_v12, %v263_v21 }
  0xa0   : > { %937 = vmatprep.subr.msk.bf16.mxu0 %vm352_vm2, %v340_v8  ;;  %939 = vmatprep.subr.msk.bf16.mxu1 %vm352_vm2, %v342_v15 }
  0xa1   : > { %472 = vmatpush1.bf16.msra.mxu0 %v366_v22  ;;  %513 = vmatpush1.bf16.msra.mxu1 %v372_v23 }
  0xa2   : > { %514 = vmatprep.subr.bf16.mxu1 %v334_v19  ;;  %473 = vmatprep.subr.bf16.mxu0 %v332_v18 }
  0xa3   : > { %491 = vmatprep.mubr.bf16.mxu0 %v1133_v11  ;;  %532 = vmatprep.mubr.bf16.mxu1 %v1133_v11 }
  0xa5   : > { %474 = vmatpush1.bf16.msra.mxu0 %v331_v24  ;;  %515 = vmatpush1.bf16.msra.mxu1 %v333_v25  ;;  %v346_v26 = vpop.permute.xlu1 %345 }
  0xa8   : > { %938 = vmatmul.mubr.msk.bf16.vlgmr.msra.gmra.mxu0 %vm348_vm7, %v233_v63  ;;  %940 = vmatmul.mubr.msk.bf16.vlgmr.msra.gmra.mxu1 %vm348_vm7, %v233_v63 }
  0xa9   : > { %693 = vmatprep.mubr.bf16.mxu0 %v1133_v11  ;;  %734 = vmatprep.mubr.bf16.mxu1 %v1133_v11 }
 0x15f   : > { %v411_v27 = vpop.f32.mrf.mxu0  ;;  %v452_v28 = vpop.f32.mrf.mxu1 }
 0x160   : > { %v1341_v29 = vadd.f32 %v411_v27, %v346_v26  ;;  %v1343_v30 = vadd.f32 %v452_v28, %v346_v26 }
 0x161   : > { %v413_v31 = vpop.f32.mrf.mxu0  ;;  %v454_v32 = vpop.f32.mrf.mxu1 }
 0x162   : > { %v543_v33 = vmax.f32 %v1343_v30, 0.0  ;;  %v1346_v34 = vadd.f32 %v413_v31, %v346_v26  ;;  %v1348_v35 = vadd.f32 %v454_v32, %v346_v26  ;;  %v541_v39 = vmax.f32 %v1341_v29, 0.0 }
 0x163   : > { %v415_v37 = vpop.f32.mrf.mxu0  ;;  %v456_v38 = vpop.f32.mrf.mxu1 }
 0x164   : > { %v542_v40 = vmax.f32 %v1346_v34, 0.0  ;;  %v544_v41 = vmax.f32 %v1348_v35, 0.0 }
 0x165   : > { %v416_v42 = vpop.f32.mrf.mxu0  ;;  %v457_v43 = vpop.f32.mrf.mxu1 }
 0x166   : > { %v1043_v44 = vpack.i.bf16 %v544_v41, %v543_v33  ;;  %v1038_v45 = vpack.i.bf16 %v542_v40, %v541_v39 }
 0x168   : > { %v493_v46 = vpop.f32.mrf.mxu0  ;;  %1044 = vrot.lane.b32.xlu1 %v1043_v44, %s1131_s10  ;;  %v534_v47 = vpop.f32.mrf.mxu1  ;;  %1039 = vrot.lane.b32.xlu0 %v1038_v45, %s1131_s10 }
 0x169   : > { %v494_v48 = vadd.f32 %v493_v46, %v346_v26  ;;  %v535_v58 = vadd.f32 %v534_v47, %v346_v26 }
 0x16a   : > { %v495_v49 = vpop.f32.mrf.mxu0  ;;  %v536_v50 = vpop.f32.mrf.mxu1 }
 0x16b   : > { %v1361_v51 = vmax.f32 %v494_v48, 0.0  ;;  %v496_v52 = vadd.f32 %v495_v49, %v346_v26  ;;  %v537_v53 = vadd.f32 %v536_v50, %v346_v26  ;;  %v1373_v62 = vmax.f32 %v535_v58, 0.0  ;;  %v234_v50 = vld [vmem:[%s1511_s3] sm:$0xf] }
 0x16c   : > { %v497_v54 = vpop.f32.mrf.mxu0  ;;  %v538_v55 = vpop.f32.mrf.mxu1  ;;  %1049 = vrot.lane.b32.xlu1 %v1038_v45, %s1132_s11 }
 0x16d   : > { %v1364_v57 = vmax.f32 %v537_v53, 0.0  ;;  %589 = vrot.lane.b32.xlu0 %v1361_v51, %s1131_s10  ;;  %v1368_v61 = vmax.f32 %v496_v52, 0.0 }
 0x16e   : > { %v498_v59 = vpop.f32.mrf.mxu0  ;;  %v539_v60 = vpop.f32.mrf.mxu1 }
 0x16f   : > { %v1058_v63 = vpack.i.bf16 %v1368_v61, %v1364_v57  ;;  %v1063_v3 = vpack.i.bf16 %v1368_v61, %v1361_v51 }
 0x170   : > { %563 = vrot.lane.b32.xlu1 %v1364_v57, %s1132_s11 }
 0x171   : > { %1054 = vrot.lane.b32.xlu0 %v1043_v44, %s1132_s11 }
 0x174   : > { %593 = vrot.lane.b32.xlu1 %v1373_v62, %s1131_s10 }
 0x175   : > { %1059 = vrot.lane.b32.xlu0 %v1058_v63, %s1131_s10 }
 0x178   : > { %561 = vrot.lane.b32.xlu1 %v1373_v62, %s1132_s11 }
 0x179   : > { %1064 = vrot.lane.b32.xlu0 %v1063_v3, %s1132_s11  ;;  %s862_s11 = scalar_lea.hbm %s1513_s5, %s958_s7 }
 0x17d   : > { %631 = vperm.xlu0 %1068, %v236_v7  }
 0x1da   : > { %v1045_v8 = vpop.permute.xlu1 %1044  ;;  %v1040_v10 = vpop.permute.xlu0 %1039 }
 0x1db   : > { %v1047_v13 = vunpack.i.h.bf16 %v1045_v8  ;;  %v1046_v14 = vunpack.i.l.bf16 %v1045_v8  ;;  %v1042_v15 = vunpack.i.h.bf16 %v1040_v10  ;;  %v1041_v17 = vunpack.i.l.bf16 %v1040_v10 }
 0x1dd   : > { %v602_v18 = vsel %vm302_vm0, %v1042_v15, %v1046_v14  ;;  %v603_v19 = vsel %vm302_vm0, %v1041_v17, %v1042_v15  ;;  %v601_v20 = vsel %vm302_vm0, %v1046_v14, %v1047_v13 }
 0x1de   : > { %v622_v21 = vpack.c.bf16 %v602_v18, %v602_v18  ;;  %v1050_v22 = vpop.permute.xlu1 %1049  ;;  %v621_v23 = vpack.c.bf16 %v603_v19, %v603_v19  ;;  %v623_v27 = vpack.c.bf16 %v601_v20, %v601_v20 }
 0x1df   : > { %v1052_v24 = vunpack.i.h.bf16 %v1050_v22  ;;  %v1051_v25 = vunpack.i.l.bf16 %v1050_v22  ;;  %v590_v26 = vpop.permute.xlu0 %589 }
 0x1e0   : > { %v600_v28 = vsel %vm302_vm0, %v1047_v13, %v590_v26  ;;  %941 = vmatprep.subr.msk.bf16.mxu0 %vm352_vm2, %v622_v21  ;;  %v638_v31 = vsel %vm352_vm2, %v621_v23, 0  ;;  %v644_v44 = vsel %vm352_vm2, %v623_v27, 0 }
 0x1e1   : > { %v624_v32 = vpack.c.bf16 %v600_v28, %v600_v28  ;;  %674 = vmatpush1.bf16.msra.mxu0 %v638_v31  ;;  %v571_v34 = vsel %vm261_vm1, %v1051_v25, %v1052_v24 }
 0x1e2   : > { %v564_v37 = vpop.permute.xlu1 %563  ;;  %v614_v38 = vpack.c.bf16 %v542_v40, %v571_v34 }
 0x1e3   : > { %v572_v42 = vsel %vm261_vm1, %v564_v37, %v1051_v25  ;;  %946 = vmatprep.subr.msk.bf16.mxu1 %vm352_vm2, %v624_v32  ;;  %v1055_v43 = vpop.permute.xlu0 %1054 }
 0x1e4   : > { %v943_v45 = vpack.c.bf16 %v541_v39, %v572_v42  ;;  %v1057_v46 = vunpack.i.h.bf16 %v1055_v43  ;;  %v1056_v47 = vunpack.i.l.bf16 %v1055_v43  ;;  %715 = vmatpush1.bf16.msra.mxu1 %v644_v44  ;;  %675 = vmatprep.subr.bf16.mxu0 %v614_v38 }
 0x1e6   : > { %v570_v48 = vsel %vm261_vm1, %v1052_v24, %v1056_v47  ;;  %v594_v49 = vpop.permute.xlu1 %593  ;;  %944 = vmatpush1.bf16.msk.msra.mxu0 %vm1298_vm5, %v943_v45  ;;  %v569_v40 = vsel %vm261_vm1, %v1056_v47, %v1057_v46 }
 0x1e7   : > { %v615_v29 = vpack.c.bf16 %v543_v33, %v570_v48  ;;  %v1060_v39 = vpop.permute.xlu0 %1059  ;;  %v616_v52 = vpack.c.bf16 %v544_v41, %v569_v40 }
 0x1e8   : > { %v1062_v53 = vunpack.i.h.bf16 %v1060_v39  ;;  %v1061_v54 = vunpack.i.l.bf16 %v1060_v39 }
 0x1e9   : > { %716 = vmatprep.subr.bf16.mxu1 %v616_v52  ;;  %945 = vmatmul.mubr.msk.bf16.vlgmr.msra.gmra.mxu0 %vm348_vm7, %v234_v50 }
 0x1ea   : > { %v598_v56 = vsel %vm302_vm0, %v1062_v53, %v594_v49  ;;  %v604_v55 = vsel %vm302_vm0, %v1061_v54, %v1041_v17  ;;  %717 = vmatpush1.bf16.msra.mxu1 %v615_v29  ;;  %v562_v58 = vpop.permute.xlu1 %561  ;;  %v599_v30 = vsel %vm302_vm0, %v590_v26, %v1062_v53  ;;  %v597_v33 = vsel %vm302_vm0, %v594_v49, %v1061_v54 }
 0x1eb   : > { %v626_v35 = vpack.c.bf16 %v598_v56, %v598_v56  ;;  %v612_v41 = vsel %vm318_vm6, %v604_v55, 0.0  ;;  %v565_v59 = vsel %vm261_vm1, %v562_v58, %v564_v37  ;;  %v1065_v60 = vpop.permute.xlu0 %1064  ;;  %v625_v63 = vpack.c.bf16 %v599_v30, %v599_v30  ;;  %775 = vmatprep.mubr.bf16.mxu0 %v1133_v11 }
 0x1ec   : > { %v1067_v3 = vunpack.i.h.bf16 %v1065_v60  ;;  %v1066_v7 = vunpack.i.l.bf16 %v1065_v60  ;;  %v628_v8 = vpack.c.bf16 %v612_v41, %v612_v41  ;;  %v620_v10 = vpack.c.bf16 %v1364_v57, %v565_v59 }
 0x1ed   : > { %947 = vmatmul.mubr.msk.bf16.vlgmr.msra.gmra.mxu1 %vm348_vm7, %v234_v50  ;;  %948 = vmatprep.subr.msk.bf16.mxu0 %vm352_vm2, %v626_v35  ;;  %v650_v13 = vsel %vm352_vm2, %v625_v63, 0  ;;  %v627_v36 = vpack.c.bf16 %v597_v33, %v597_v33 }
 0x1ee   : > { %v568_v14 = vsel %vm261_vm1, %v1057_v46, %v1066_v7  ;;  %756 = vmatpush1.bf16.msra.mxu0 %v650_v13  ;;  %950 = vmatprep.subr.msk.bf16.mxu1 %vm352_vm2, %v628_v8  ;;  %v567_v15 = vsel %vm261_vm1, %v1066_v7, %v1067_v3  ;;  %v566_v57 = vsel %vm261_vm1, %v1067_v3, %v562_v58 }
 0x1ef   : > { %v617_v17 = vpack.c.bf16 %v1361_v51, %v568_v14  ;;  %v656_v18 = vsel %vm352_vm2, %v627_v36, 0  ;;  %v618_v19 = vpack.c.bf16 %v1368_v61, %v567_v15  ;;  %816 = vmatprep.mubr.bf16.mxu1 %v1133_v11  ;;  %v619_v20 = vpack.c.bf16 %v1373_v62, %v566_v57 }
 0x1f0   : > { %797 = vmatpush1.bf16.msra.mxu1 %v656_v18 }
 0x1f1   : > { %798 = vmatprep.subr.bf16.mxu1 %v620_v10  ;;  %757 = vmatprep.subr.bf16.mxu0 %v618_v19 }
 0x1f2   : > { %758 = vmatpush1.bf16.msra.mxu0 %v617_v17 }
 0x1f4   : > { %799 = vmatpush1.bf16.msra.mxu1 %v619_v20 }
 0x1f5   : > { %949 = vmatmul.mubr.msk.bf16.vlgmr.msra.gmra.mxu0 %vm348_vm7, %v234_v50 }
 0x1f7   : > { %951 = vmatmul.mubr.msk.bf16.vlgmr.msra.gmra.mxu1 %vm348_vm7, %v234_v50 }
 0x1f8   : > { %v632_v16 = vpop.permute.xlu0 %631 }
 0x2a9   : > { %v695_v51 = vpop.f32.mrf.mxu0 }
 0x2aa   : > { %v696_v21 = vadd.f32 %v695_v51, %v632_v16 }
 0x2ab   : > { %v697_v61 = vpop.f32.mrf.mxu0 }
 0x2ac   : > { %v698_v22 = vadd.f32 %v697_v61, %v632_v16  ;;  %v825_v11 = vmax.f32 %v696_v21, 0.0 }
 0x2ad   : > { %v736_v23 = vpop.f32.mrf.mxu1  ;;  %v699_v24 = vpop.f32.mrf.mxu0 }
 0x2ae   : > { %v737_v25 = vadd.f32 %v736_v23, %v632_v16  ;;  %v826_v26 = vmax.f32 %v698_v22, 0.0  ;;  %v833_v62 = vadd.f32 %v825_v11, %v1223_v2 }
 0x2af   : > { %v738_v27 = vpop.f32.mrf.mxu1  ;;  %v700_v28 = vpop.f32.mrf.mxu0 }
 0x2b0   : > { %v827_v31 = vmax.f32 %v737_v25, 0.0  ;;  %v834_v32 = vadd.f32 %v826_v26, %v1227_v4  ;;  %841 = vst [vmem:[%s1456_s6] sm:$0xff] %v833_v62  ;;  %v739_v34 = vadd.f32 %v738_v27, %v632_v16 }
 0x2b1   : > { %v740_v37 = vpop.f32.mrf.mxu1 }
 0x2b2   : > { %v835_v38 = vadd.f32 %v827_v31, %v1229_v5  ;;  %842 = vst [vmem:[%s1456_s6 + $0x8] sm:$0xff] %v834_v32  ;;  %v828_v42 = vmax.f32 %v739_v34, 0.0 }
 0x2b3   : > { %v741_v43 = vpop.f32.mrf.mxu1 }
 0x2b4   : > { %843 = vst [vmem:[%s1456_s6 + $0x10] sm:$0xff] %v835_v38  ;;  %v836_v2 = vadd.f32 %v828_v42, %v1231_v6 }
 0x2b5   : > { %v777_v44 = vpop.f32.mrf.mxu0 }
 0x2b6   : > { %844 = vst [vmem:[%s1456_s6 + $0x18] sm:$0xff] %v836_v2  ;;  %v778_v4 = vadd.f32 %v777_v44, %v632_v16 }
 0x2b7   : > { %v818_v45 = vpop.f32.mrf.mxu1  ;;  %v779_v46 = vpop.f32.mrf.mxu0 }
 0x2b8   : > { %v829_v47 = vmax.f32 %v778_v4, 0.0  ;;  %v819_v48 = vadd.f32 %v818_v45, %v632_v16  ;;  %v780_v49 = vadd.f32 %v779_v46, %v632_v16 }
 0x2b9   : > { %v820_v40 = vpop.f32.mrf.mxu1  ;;  %v781_v5 = vpop.f32.mrf.mxu0 }
 0x2ba   : > { %v837_v50 = vadd.f32 %v829_v47, %v1219_v0  ;;  %v831_v29 = vmax.f32 %v819_v48, 0.0  ;;  %v830_v39 = vmax.f32 %v780_v49, 0.0  ;;  %v821_v6 = vadd.f32 %v820_v40, %v632_v16 }
 0x2bb   : > { %v822_v52 = vpop.f32.mrf.mxu1  ;;  %v782_v53 = vpop.f32.mrf.mxu0 }
 0x2bc   : > { %845 = vst [vmem:[%s1456_s6 + $0x20] sm:$0xff] %v837_v50  ;;  %v839_v54 = vadd.f32 %v831_v29, %v1246_v12  ;;  %v838_v56 = vadd.f32 %v830_v39, %v1221_v1  ;;  %v832_v55 = vmax.f32 %v821_v6, 0.0 }
 0x2bd   : > { %v823_v58 = vpop.f32.mrf.mxu1 }
 0x2be   : > { %847 = vst [vmem:[%s1456_s6 + $0x30] sm:$0xff] %v839_v54  ;;  %846 = vst [vmem:[%s1456_s6 + $0x28] sm:$0xff] %v838_v56  ;;  %v840_v0 = vadd.f32 %v832_v55, %v1239_v9 }
 0x2c0   : > { %848 = vst [vmem:[%s1456_s6 + $0x38] sm:$0xff] %v840_v0 }
 0x2c1   : > { %1082 = shalt.err (!%p1079_p3)
}
 0x2c2   : > { %s1083_s16 = scalar_lea.hbm %s862_s11, 1024  ;;  %s1087_s25 = scalar_lea.hbm %s1513_s5, 2048 }
 0x2c3   : > { %p1084_p4 = scmp.ne.s32.totalorder %s862_s11, %s1083_s16  ;;  %p1088_p9 = scmp.lt.s32.totalorder %s862_s11, %s1513_s5 }
 0x2c4   : > { %p1089_p10 = scmp.lt.s32.totalorder %s1087_s25, %s1083_s16 }
 0x2c5   : > { %p1085_p7 = pnand %p1084_p4, %p1204_p5 }
 0x2c6   : > { %p1090_p11 = por %p1089_p10, %p1088_p9 }
 0x2c7   : > { %p1086_p8 = pneg %p1085_p7 }
 0x2c9   : > { %p1091_p12 = pnand %p1090_p11, %p1086_p8 }
 0x2cb   : > { %1094 = shalt.err (!%p1091_p12)
}
 0x2cc   : > { %959 = dma.vmem_to_hbm [thread:$0]  (%p1204_p5), %s865_s8, 1024, %s862_s11, %s850_s22  }
 0x2cd PF: > { %p965_p13 = scmp.ge.s32.totalorder %s1129_s21, 2  ;;  %s876_s6 = sand.u32 1, %s1117_s18  }
 0x2ce   : > { %s877_s7 = scalar_lea.sflag [#allocation3], %s876_s6 }
 0x2cf   : > { %p962_p0 = pnand %p965_p13, %p1208_p6 }
 0x2d1   : > { %p963_p1 = pneg %p962_p0 }
 0x2d3   : > { %1112 = dma.done.wait (%p963_p1), %s877_s7, 1024  }
 0x2d4   : > { %1114 = vsyncadd (%p963_p1), %s877_s7, 4294966272  ;;  %p15_p2 = scmp.ge.s32.totalorder %s1191_s24, 4   ;;  %s1518_s18 = smov %s1121_s19 }
 0x2d5   : > { %s1519_s19 = smov %s1125_s20  ;;  %s1520_s20 = smov %s1202_s27 }
 0x2d6   : > { %s1521_s21 = smov %s1191_s24  ;;  %17 = sbr.rel (!%p15_p2) target bundleno = 3 (0x3), region = 75 }
 0x2db   :  { %882 = vsyncpa [#allocation3], 1 }
 0x2dc   :  { %884 = vsyncpa [#allocation3 + $0x1], 1 }

</bundles_post_ra>
